<compile_context>
chip_gen: v5e
topology: v5e:2x2
jax: 0.10.0
libtpu: 0.0.40
codegen_flags: <defaults>
</compile_context>

<pallas_src>
import functools

import jax
import jax.numpy as jnp
from jax.experimental import pallas as pl
from jax.experimental.pallas import tpu as pltpu


R_MAX = 512  # rows (sublanes) per block -> 512*128 = 65536 samples per step


def _round_up(x, m):
    return ((x + m - 1) // m) * m


def _focal_loss_kernel(predict_ref, target_ref, alpha_ref, out_ref, acc_ref,
                       *, gamma):
    i = pl.program_id(1)  # reduction ("arbitrary") axis

    @pl.when(i == 0)
    def _():
        acc_ref[...] = jnp.zeros_like(acc_ref)

    x = predict_ref[...].astype(jnp.float32)        # (C, R, 128) logits
    tgt = target_ref[...]                           # (R, 128) int32, -1 = pad
    alpha = alpha_ref[...].astype(jnp.float32)      # (C, 1, 1) per-class alpha

    # log-softmax over the class axis (leading dim => elementwise VPU ops)
    m = jnp.max(x, axis=0)                          # (R, 128)
    e = jnp.exp(x - m)                              # (C, R, 128)
    lse = jnp.log(jnp.sum(e, axis=0))               # (R, 128)

    # one-hot class mask; padded columns (tgt = -1) match no class
    cls_ids = jax.lax.broadcasted_iota(jnp.int32, x.shape, 0)   # (C, R, 128)
    class_mask = (cls_ids == tgt).astype(jnp.float32)           # (C, R, 128)

    # true-class logit and alpha gathered through the same mask
    x_true = jnp.sum(x * class_mask, axis=0)                    # (R, 128)
    alpha_sel = jnp.sum(class_mask * alpha, axis=0)             # (R, 128)

    log_p = (x_true - m) - lse                                  # (R, 128)
    probs = jnp.exp(log_p)
    one_minus = 1.0 - probs

    # (1 - p)^gamma : VPU multiplies for small integer gamma, power otherwise
    g = float(gamma)
    if g == int(g) and 0 <= int(g) <= 8:
        focal = jnp.ones_like(one_minus)
        for _ in range(int(g)):
            focal = focal * one_minus
    else:
        focal = jnp.power(one_minus, g)

    # dense lane-parallel accumulation (padded columns contribute exactly 0)
    acc_ref[...] += -alpha_sel * focal * log_p                  # (R, 128)

    @pl.when(i == pl.num_programs(1) - 1)
    def _():
        r = acc_ref.shape[0]
        # single sublane-fold to an (8, 128) partial; final scalar reduce and
        # mean/sum handling happen in the wrapper.
        out_ref[...] = acc_ref[...].reshape(r // 8, 8, 128).sum(
            axis=0, keepdims=True)


def multi_ce_focal_loss(predict, target, alpha, *, gamma=2.0,
                        reduction="mean", class_major=False):
    """predict: (N, C) float (or (C, N) if class_major), target: (N,) int,
    alpha: (C, 1) float.  Returns the scalar focal loss."""
    if reduction not in ("mean", "sum"):
        # TODO(synk): reduction='none' (per-sample output) not implemented.
        raise ValueError("only reduction='mean'/'sum' supported")

    if class_major:
        c, n = predict.shape
        predict_cn = predict
    else:
        n, c = predict.shape
        # NOTE: this transpose is a full extra HBM pass; prefer an upstream
        # producer that emits predict as (C, N) and class_major=True.
        predict_cn = predict.T

    # ---- tiling: dense (R, 128) batch blocks, padding only to what's needed
    nblk = pl.cdiv(n, 128)                       # 128-sample lane groups
    total_steps = max(1, pl.cdiv(nblk, R_MAX))
    p_cores = 2 if total_steps >= 2 else 1       # megacore split (v7x: 2 TCs)
    total_steps = _round_up(total_steps, p_cores)
    r = _round_up(pl.cdiv(nblk, total_steps), 8)  # rows per block, mult of 8
    nblk_pad = total_steps * r
    padded_n = nblk_pad * 128
    steps_per_core = total_steps // p_cores

    # ---- wrapper-side relayout (native dtype preserved for predict)
    predict_b = jnp.pad(predict_cn, ((0, 0), (0, padded_n - n))
                        ).reshape(c, nblk_pad, 128)
    target_b = jnp.pad(target.astype(jnp.int32), (0, padded_n - n),
                       constant_values=-1).reshape(nblk_pad, 128)
    alpha_b = jnp.asarray(alpha).reshape(c, 1, 1)

    kernel = functools.partial(_focal_loss_kernel, gamma=float(gamma))

    partials = pl.pallas_call(
        kernel,
        out_shape=jax.ShapeDtypeStruct((p_cores, 8, 128), jnp.float32),
        grid_spec=pltpu.PrefetchScalarGridSpec(
            num_scalar_prefetch=0,
            grid=(p_cores, steps_per_core),
            in_specs=[
                # predict (C, NBLK, 128)
                pl.BlockSpec((c, r, 128),
                             lambda p, i: (0, p * steps_per_core + i, 0)),
                # target (NBLK, 128)
                pl.BlockSpec((r, 128),
                             lambda p, i: (p * steps_per_core + i, 0)),
                # alpha (C, 1, 1), resident
                pl.BlockSpec((c, 1, 1), lambda p, i: (0, 0, 0)),
            ],
            out_specs=pl.BlockSpec((1, 8, 128), lambda p, i: (p, 0, 0)),
            scratch_shapes=[pltpu.VMEM((r, 128), jnp.float32)],
        ),
        compiler_params=pltpu.CompilerParams(
            dimension_semantics=("parallel", "arbitrary"),
            vmem_limit_bytes=32 * 1024 * 1024),
    )(predict_b, target_b, alpha_b)

    total = jnp.sum(partials)
    if reduction == "mean":
        total = total / jnp.float32(n)
    return total


def _reference(predict, target, alpha, gamma=2.0):
    pt = jax.nn.softmax(predict.astype(jnp.float32), axis=1)
    class_mask = jax.nn.one_hot(target, predict.shape[1], dtype=jnp.float32)
    alpha_sel = alpha.reshape(-1)[target].reshape(-1, 1)
    probs = jnp.sum(pt * class_mask, axis=1).reshape(-1, 1)
    log_p = jnp.log(probs)
    loss = -alpha_sel * jnp.power(1.0 - probs, gamma) * log_p
    return jnp.mean(loss)


if __name__ == "__main__":
    key = jax.random.PRNGKey(0)
    k1, k2, k3, k4 = jax.random.split(key, 4)

    # Small shapes consistent with the module: batch=8, class_num=4.
    batch, class_num, gamma = 8, 4, 2.0
    predict = jax.random.normal(k1, (batch, class_num), dtype=jnp.float32)
    target = jax.random.randint(k2, (batch,), 0, class_num, dtype=jnp.int32)
    # Deterministic init matching nn.Module default: alpha = ones(class_num, 1)
    alpha = jnp.ones((class_num, 1), dtype=jnp.float32)

    loss = jax.block_until_ready(
        multi_ce_focal_loss(predict, target, alpha, gamma=gamma))
    ref = _reference(predict, target, alpha, gamma=gamma)
    assert jnp.allclose(loss, ref, rtol=1e-5, atol=1e-6), (loss, ref)

    # Secondary check: exercises the multi-block / 2-core grid + padding path.
    n_big = 70000
    predict_big = jax.random.normal(k3, (n_big, class_num), dtype=jnp.float32)
    target_big = jax.random.randint(k4, (n_big,), 0, class_num,
                                    dtype=jnp.int32)
    loss_big = jax.block_until_ready(
        multi_ce_focal_loss(predict_big, target_big, alpha, gamma=gamma))
    ref_big = _reference(predict_big, target_big, alpha, gamma=gamma)
    assert jnp.allclose(loss_big, ref_big, rtol=1e-4, atol=1e-6), (loss_big,
                                                                   ref_big)

    print("KERNEL_OK")
</pallas_src>

<mosaic_0001>
module attributes {stable_mosaic.version = 11 : i64} {
  func.func @_focal_loss_kernel(%arg0: i32, %arg1: i32, %arg2: memref<4x8x128xf32, #tpu.memory_space<vmem>>, %arg3: memref<8x128xi32, #tpu.memory_space<vmem>>, %arg4: memref<4x1x1xf32, #tpu.memory_space<vmem>>, %arg5: memref<1x8x128xf32, #tpu.memory_space<vmem>>, %arg6: memref<8x128xf32, #tpu.memory_space<vmem>>) attributes {dimension_semantics = [#tpu.dimension_semantics<parallel>, #tpu.dimension_semantics<arbitrary>], iteration_bounds = array<i64: 1, 1>, scalar_prefetch = 0 : i64, scratch_operands = 1 : i64, tpu.core_type = #tpu.core_type<tc>, window_params = [{transform_indices = @transform_0, window_bounds = array<i64: 4, 8, 128>}, {transform_indices = @transform_1, window_bounds = array<i64: 8, 128>}, {pipeline_mode = #tpu.pipeline_mode<synchronous>, transform_indices = @transform_2, window_bounds = array<i64: 4, 1, 1>}, {transform_indices = @transform_3, window_bounds = array<i64: 1, 8, 128>}]} {
    %c0_i32 = arith.constant 0 : i32
    %0 = arith.cmpi eq, %arg1, %c0_i32 : i32
    %1 = arith.extui %0 : i1 to i32
    %c0_i32_0 = arith.constant 0 : i32
    %2 = arith.cmpi ne, %1, %c0_i32_0 : i32
    scf.if %2 {
      %cst_20 = arith.constant 0.000000e+00 : f32
      %42 = vector.broadcast %cst_20 : f32 to vector<8x128xf32>
      %c0_21 = arith.constant 0 : index
      %c0_22 = arith.constant 0 : index
      %43 = vector.load %arg6[%c0_21, %c0_22] : memref<8x128xf32, #tpu.memory_space<vmem>>, vector<8x128xf32>
      tpu.vector_store %arg6[%c0_21, %c0_22], %42 {strides = array<i32>} : memref<8x128xf32, #tpu.memory_space<vmem>>, vector<8x128xf32>,
    } else {
    }
    %c0 = arith.constant 0 : index
    %c0_1 = arith.constant 0 : index
    %c0_2 = arith.constant 0 : index
    %3 = vector.load %arg2[%c0, %c0_1, %c0_2] : memref<4x8x128xf32, #tpu.memory_space<vmem>>, vector<4x8x128xf32>
    %c0_3 = arith.constant 0 : index
    %c0_4 = arith.constant 0 : index
    %4 = vector.load %arg3[%c0_3, %c0_4] : memref<8x128xi32, #tpu.memory_space<vmem>>, vector<8x128xi32>
    %c0_5 = arith.constant 0 : index
    %c0_6 = arith.constant 0 : index
    %c0_7 = arith.constant 0 : index
    %5 = vector.load %arg4[%c0_5, %c0_6, %c0_7] : memref<4x1x1xf32, #tpu.memory_space<vmem>>, vector<4x1x1xf32>
    %cst = arith.constant dense<0xFF800000> : vector<8x128xf32>
    %6 = vector.multi_reduction <maximumf>, %3, %cst [0] : vector<4x8x128xf32> to vector<8x128xf32>
    %7 = vector.shape_cast %6 : vector<8x128xf32> to vector<1x8x128xf32>
    %8 = vector.broadcast %7 : vector<1x8x128xf32> to vector<4x8x128xf32>
    %9 = arith.subf %3, %8 : vector<4x8x128xf32>
    %10 = math.exp %9 : vector<4x8x128xf32>
    %cst_8 = arith.constant dense<0.000000e+00> : vector<8x128xf32>
    %11 = vector.multi_reduction <add>, %10, %cst_8 [0] : vector<4x8x128xf32> to vector<8x128xf32>
    %12 = math.log %11 : vector<8x128xf32>
    %13 = tpu.iota {dimensions = array<i32: 0>} : vector<4x8x128xi32>
    %14 = vector.shape_cast %4 : vector<8x128xi32> to vector<1x8x128xi32>
    %15 = vector.broadcast %14 : vector<1x8x128xi32> to vector<4x8x128xi32>
    %16 = arith.cmpi eq, %13, %15 : vector<4x8x128xi32>
    %17 = arith.extui %16 : vector<4x8x128xi1> to vector<4x8x128xi32>
    %18 = arith.sitofp %17 : vector<4x8x128xi32> to vector<4x8x128xf32>
    %19 = arith.mulf %3, %18 : vector<4x8x128xf32>
    %cst_9 = arith.constant dense<0.000000e+00> : vector<8x128xf32>
    %20 = vector.multi_reduction <add>, %19, %cst_9 [0] : vector<4x8x128xf32> to vector<8x128xf32>
    %21 = vector.broadcast %5 : vector<4x1x1xf32> to vector<4x8x128xf32>
    %22 = arith.mulf %18, %21 : vector<4x8x128xf32>
    %cst_10 = arith.constant dense<0.000000e+00> : vector<8x128xf32>
    %23 = vector.multi_reduction <add>, %22, %cst_10 [0] : vector<4x8x128xf32> to vector<8x128xf32>
    %24 = arith.subf %20, %6 : vector<8x128xf32>
    %25 = arith.subf %24, %12 : vector<8x128xf32>
    %26 = math.exp %25 : vector<8x128xf32>
    %cst_11 = arith.constant 1.000000e+00 : f32
    %27 = vector.broadcast %cst_11 : f32 to vector<8x128xf32>
    %28 = arith.subf %27, %26 : vector<8x128xf32>
    %cst_12 = arith.constant 1.000000e+00 : f32
    %29 = vector.broadcast %cst_12 : f32 to vector<8x128xf32>
    %30 = arith.mulf %29, %28 : vector<8x128xf32>
    %31 = arith.mulf %30, %28 : vector<8x128xf32>
    %c0_13 = arith.constant 0 : index
    %c0_14 = arith.constant 0 : index
    %32 = vector.load %arg6[%c0_13, %c0_14] : memref<8x128xf32, #tpu.memory_space<vmem>>, vector<8x128xf32>
    %cst_15 = arith.constant 0.000000e+00 : f32
    %33 = vector.broadcast %cst_15 : f32 to vector<8x128xf32>
    %34 = arith.subf %33, %23 : vector<8x128xf32>
    %35 = arith.mulf %34, %31 : vector<8x128xf32>
    %36 = arith.mulf %35, %25 : vector<8x128xf32>
    %37 = arith.addf %32, %36 : vector<8x128xf32>
    %c0_16 = arith.constant 0 : index
    %c0_17 = arith.constant 0 : index
    %38 = vector.load %arg6[%c0_16, %c0_17] : memref<8x128xf32, #tpu.memory_space<vmem>>, vector<8x128xf32>
    tpu.vector_store %arg6[%c0_16, %c0_17], %37 {strides = array<i32>} : memref<8x128xf32, #tpu.memory_space<vmem>>, vector<8x128xf32>,
    %c0_i32_18 = arith.constant 0 : i32
    %39 = arith.cmpi eq, %arg1, %c0_i32_18 : i32
    %40 = arith.extui %39 : i1 to i32
    %c0_i32_19 = arith.constant 0 : i32
    %41 = arith.cmpi ne, %40, %c0_i32_19 : i32
    scf.if %41 {
      %c0_20 = arith.constant 0 : index
      %c0_21 = arith.constant 0 : index
      %42 = vector.load %arg6[%c0_20, %c0_21] : memref<8x128xf32, #tpu.memory_space<vmem>>, vector<8x128xf32>
      %43 = vector.shape_cast %42 : vector<8x128xf32> to vector<1x8x128xf32>
      %cst_22 = arith.constant dense<0.000000e+00> : vector<8x128xf32>
      %44 = vector.multi_reduction <add>, %43, %cst_22 [0] : vector<1x8x128xf32> to vector<8x128xf32>
      %45 = vector.shape_cast %44 : vector<8x128xf32> to vector<1x8x128xf32>
      %c0_23 = arith.constant 0 : index
      %c0_24 = arith.constant 0 : index
      %c0_25 = arith.constant 0 : index
      %46 = vector.load %arg5[%c0_23, %c0_24, %c0_25] : memref<1x8x128xf32, #tpu.memory_space<vmem>>, vector<1x8x128xf32>
      tpu.vector_store %arg5[%c0_23, %c0_24, %c0_25], %45 {strides = array<i32>} : memref<1x8x128xf32, #tpu.memory_space<vmem>>, vector<1x8x128xf32>,
    } else {
    }
    return
  }
  func.func @transform_0(%arg0: i32, %arg1: i32) -> (i32, i32, i32) {
    %c1_i32 = arith.constant 1 : i32
    %0 = arith.muli %arg0, %c1_i32 : i32
    %1 = arith.addi %0, %arg1 : i32
    %c0_i32 = arith.constant 0 : i32
    %c0_i32_0 = arith.constant 0 : i32
    %c0_i32_1 = arith.constant 0 : i32
    return %c0_i32, %1, %c0_i32_0 : i32, i32, i32
  }
  func.func @transform_1(%arg0: i32, %arg1: i32) -> (i32, i32) {
    %c1_i32 = arith.constant 1 : i32
    %0 = arith.muli %arg0, %c1_i32 : i32
    %1 = arith.addi %0, %arg1 : i32
    %c0_i32 = arith.constant 0 : i32
    %c0_i32_0 = arith.constant 0 : i32
    return %1, %c0_i32 : i32, i32
  }
  func.func @transform_2(%arg0: i32, %arg1: i32) -> (i32, i32, i32) {
    %c0_i32 = arith.constant 0 : i32
    %c0_i32_0 = arith.constant 0 : i32
    %c0_i32_1 = arith.constant 0 : i32
    %c0_i32_2 = arith.constant 0 : i32
    return %c0_i32, %c0_i32_0, %c0_i32_1 : i32, i32, i32
  }
  func.func @transform_3(%arg0: i32, %arg1: i32) -> (i32, i32, i32) {
    %c0_i32 = arith.constant 0 : i32
    %c0_i32_0 = arith.constant 0 : i32
    %c0_i32_1 = arith.constant 0 : i32
    return %arg0, %c0_i32, %c0_i32_0 : i32, i32, i32
  }
}

</mosaic_0001>

<bundles_post_ra>
// kernel: tpu_custom_call.1
= control target key start
LH: loop header
LB: loop body
LE: loop exit
PB: predicated region body
PF: predicated region fallthrough
CT: control target
= control target key end

     0   :  { %8 = vsyncpa [#allocation4], 0  ;;  %s328_s0 = inlined_call_operand.hbm [shape: f32[4,8,128], index: 0, kind: input, shape index: {}]   ;;  %s329_s1 = inlined_call_operand.hbm [shape: s32[8,128], index: 1, kind: input, shape index: {}]   ;;  %s330_s2 = inlined_call_operand.vmem [shape: f32[4,1,1], index: 2, kind: input, shape index: {}]   ;;  %s331_s3 = inlined_call_operand.hbm [shape: f32[1,8,128], index: 3, kind: output, shape index: {}]  }
   0x1   :  { %9 = vsyncpa [#allocation7], 0 }
   0x2   :  { %10 = vsyncpa [#allocation5], 0  ;;  %s18_s14 = sshll.u32 %s328_s0, 4  ;;  %s280_s15 = smov [#allocation3]   ;;  %s19_s14 = int_to_ptr.hbm [resolvable:$true] %s18_s14 }
   0x3   :  { %s20_s16 = sshll.u32 %s280_s15, 4  ;;  %s35_s19 = sshll.u32 %s329_s1, 4  ;;  %s21_s16 = int_to_ptr.vmem [resolvable:$true] %s20_s16  ;;  %s36_s19 = int_to_ptr.hbm [resolvable:$true] %s35_s19 }
   0x4   :  { %s281_s20 = smov 128   ;;  %s282_s21 = smov 8  }
   0x5   :  { %26 = dma.hbm_to_vmem [thread:$0]  %s19_s14, 512, %s21_s16, [#allocation4], %s281_s20, %s281_s20, %s282_s21  }
   0x6   :  { %s283_s22 = smov [#allocation6]  }
   0x7   :  { %s37_s23 = sshll.u32 %s283_s22, 4  ;;  %s38_s23 = int_to_ptr.vmem [resolvable:$true] %s37_s23 }
   0x8   :  { %40 = dma.hbm_to_vmem [thread:$0]  %s36_s19, 128, %s38_s23, [#allocation7]  }
   0x9   :  { %274 = dma.done.wait [#allocation4], 512  }
   0xa   :  { %275 = vsyncadd [#allocation4], 4294966784 }
   0xb   :  { %276 = dma.done.wait [#allocation7], 128  }
   0xc   :  { %277 = vsyncadd [#allocation7], 4294967168  ;;  %v284_v0 = vmov 0   ;;  %v186_v1 = vld [vmem:[%s330_s2 + $0x2] ss:$0 sm:$0xff]  ;;  %v60_v5 = vld [vmem:[#allocation3 + $0x10] sm:$0xff] }
   0xd   :  { %185 = vset.pattern.permute.xlu1 %v284_v0  ;;  %184 = vset.pattern.permute.xlu0 %v284_v0  ;;  %v187_v2 = vld [vmem:[%s330_s2] ss:$0 sm:$0xff]  ;;  %v188_v3 = vld [vmem:[%s330_s2 + $0x3] ss:$0 sm:$0xff]  ;;  %v189_v4 = vld [vmem:[%s330_s2 + $0x1] ss:$0 sm:$0xff] }
   0xe   :  { %123 = vperm.xlu1 %185, %v186_v1   ;;  %115 = vperm.xlu0 %184, %v187_v2   ;;  %v58_v6 = vld [vmem:[#allocation3] sm:$0xff]  ;;  %v61_v7 = vld [vmem:[#allocation3 + $0x18] sm:$0xff]  ;;  %v59_v8 = vld [vmem:[#allocation3 + $0x8] sm:$0xff]  ;;  %v285_v25 = vmov 0.0   ;;  %s286_s2 = smov [#allocation8]   ;;  %s162_s6 = sshll.u32 %s331_s3, 4  ;;  %s163_s6 = int_to_ptr.hbm [resolvable:$true] %s162_s6 }
   0xf   :  { %v68_v9 = vmax.f32 %v60_v5, %v61_v7  ;;  %v67_v10 = vmax.f32 %v58_v6, %v59_v8  ;;  %v62_v21 = vld [vmem:[#allocation6] sm:$0xff]  ;;  %s160_s30 = sshll.u32 %s286_s2, 4  ;;  %s161_s30 = int_to_ptr.vmem [resolvable:$true] %s160_s30 }
  0x10   :  { %vm87_vm0 = vcmp.eq.s32.totalorder %v62_v21, 0  ;;  %vm88_vm1 = vcmp.eq.s32.totalorder %v62_v21, 1  ;;  %vm89_vm2 = vcmp.eq.s32.totalorder %v62_v21, 2  ;;  %vm90_vm3 = vcmp.eq.s32.totalorder %v62_v21, 3 }
  0x11   :  { %v69_v11 = vmax.f32 %v67_v10, %v68_v9  ;;  %v173_v26 = vsel %vm87_vm0, 1.0, %v285_v25  ;;  %v174_v27 = vsel %vm88_vm1, 1.0, %v285_v25  ;;  %v175_v32 = vsel %vm89_vm2, 1.0, %v285_v25 }
  0x12   :  { %v99_v30 = vmul.f32 %v173_v26, %v58_v6  ;;  %v100_v31 = vmul.f32 %v174_v27, %v59_v8  ;;  %v101_v34 = vmul.f32 %v175_v32, %v60_v5  ;;  %v176_v36 = vsel %vm90_vm3, 1.0, %v285_v25 }
  0x13   :  { %v70_v12 = vsub.f32 %v58_v6, %v69_v11  ;;  %v71_v13 = vsub.f32 %v59_v8, %v69_v11  ;;  %v72_v15 = vsub.f32 %v60_v5, %v69_v11  ;;  %v73_v17 = vsub.f32 %v61_v7, %v69_v11 }
  0x14   :  { %v103_v35 = vadd.f32 %v100_v31, %v99_v30  ;;  %v102_v37 = vmul.f32 %v176_v36, %v61_v7 }
  0x15   :  { %v74_v14 = vmul.f32 1.442695, %v70_v12  ;;  %v76_v16 = vmul.f32 1.442695, %v71_v13  ;;  %v78_v18 = vmul.f32 1.442695, %v72_v15 }
  0x16   :  { %127 = vperm.xlu1 %185, %v188_v3   ;;  %119 = vperm.xlu0 %184, %v189_v4   ;;  %v80_v19 = vmul.f32 1.442695, %v73_v17  ;;  %v104_v38 = vadd.f32 %v103_v35, %v101_v34 }
  0x17   :  { %190 = vpow2.f32 %v74_v14 }
  0x18   :  { %192 = vpow2.f32 %v76_v16  ;;  %v105_v39 = vadd.f32 %v104_v38, %v102_v37 }
  0x19   :  { %194 = vpow2.f32 %v78_v18 }
  0x1a   :  { %196 = vpow2.f32 %v80_v19  ;;  %v137_v42 = vsub.f32 %v105_v39, %v69_v11 }
  0x1d   :  { %v191_v20 = vpop.eup %190 }
  0x1e   :  { %v193_v22 = vpop.eup %192 }
  0x1f   :  { %v82_v23 = vadd.f32 %v193_v22, %v191_v20  ;;  %v195_v24 = vpop.eup %194 }
  0x20   :  { %v197_v29 = vpop.eup %196 }
  0x21   :  { %v83_v28 = vadd.f32 %v195_v24, %v82_v23 }
  0x23   :  { %v84_v33 = vadd.f32 %v197_v29, %v83_v28 }
  0x25   :  { %198 = vlog2.f32 %v84_v33 }
  0x2b   :  { %v199_v40 = vpop.eup %198 }
  0x2c   :  { %v86_v41 = vmul.f32 0.6931472, %v199_v40 }
  0x2e   :  { %v138_v43 = vsub.f32 %v137_v42, %v86_v41 }
  0x30   :  { %v139_v44 = vmul.f32 1.442695, %v138_v43 }
  0x32   :  { %200 = vpow2.f32 %v139_v44 }
  0x38   :  { %v201_v47 = vpop.eup %200 }
  0x39   :  { %v141_v54 = vsub.f32 1.0, %v201_v47 }
  0x3b   :  { %v142_v58 = vmul.f32 %v141_v54, %v141_v54 }
  0x80   :  { %v124_v45 = vpop.permute.xlu1 %123  ;;  %v116_v46 = vpop.permute.xlu0 %115 }
  0x81   :  { %v130_v49 = vmul.f32 %v173_v26, %v116_v46  ;;  %v132_v52 = vmul.f32 %v175_v32, %v124_v45 }
  0x88   :  { %v120_v48 = vpop.permute.xlu0 %119  ;;  %v128_v51 = vpop.permute.xlu1 %127 }
  0x89   :  { %v131_v50 = vmul.f32 %v174_v27, %v120_v48  ;;  %v133_v55 = vmul.f32 %v176_v36, %v128_v51 }
  0x8b   :  { %v134_v53 = vadd.f32 %v131_v50, %v130_v49 }
  0x8d   :  { %v135_v56 = vadd.f32 %v134_v53, %v132_v52 }
  0x8f   :  { %v136_v57 = vadd.f32 %v135_v56, %v133_v55 }
  0x91   :  { %v144_v59 = vsub.f32 0.0, %v136_v57 }
  0x93   :  { %v145_v60 = vmul.f32 %v144_v59, %v142_v58 }
  0x95   :  { %v146_v61 = vmul.f32 %v145_v60, %v138_v43 }
  0x97   :  { %154 = vst [vmem:[#allocation8] sm:$0xff] %v146_v61 }
  0x98   :  { %165 = dma.vmem_to_hbm [thread:$0]  %s161_s30, 128, %s163_s6, [#allocation5]  }
  0x99   :  { %278 = dma.done.wait [#allocation5], 128  }
  0x9a   :  { %279 = vsyncadd [#allocation5], 4294967168 }
  0x9b   :  { %170 = vsyncpa [#allocation4], 1 }
  0x9c   :  { %171 = vsyncpa [#allocation7], 1 }
  0x9d   :  { %172 = vsyncpa [#allocation5], 1 }

</bundles_post_ra>
